<compile_context>
chip_gen: v6e
topology: v6e:2x2x1
jax: 0.10.0
libtpu: 0.0.40
codegen_flags: <defaults>
</compile_context>

<pallas_src>
import functools

import jax
import jax.numpy as jnp
from jax.experimental import pallas as pl
from jax.experimental.pallas import tpu as pltpu

HIDDEN = 768
MID = 350
MID_PAD = 384          # next multiple of 128 -> lane-dense intermediate
NUM_CLASSES = 3


def mlp_head_kernel(x_ref, w1_ref, b1_ref, w2_ref, b2_ref, o_ref):
    # Dropout(0.1) is identity at inference time.
    x = x_ref[...]                                             # (tb, 768) bf16
    h = jnp.dot(x, w1_ref[...], preferred_element_type=jnp.float32)
    h = jnp.maximum(h + b1_ref[...], 0.0)                      # f32 bias + ReLU (VPU)
    # Dropout(0.1) is identity at inference time.
    y = jnp.dot(h.astype(jnp.bfloat16), w2_ref[...],
                preferred_element_type=jnp.float32)
    o_ref[...] = (y + b2_ref[...]).astype(o_ref.dtype)


def _cost_estimate(batch):
    flops = 2 * batch * HIDDEN * MID + 2 * batch * MID * NUM_CLASSES
    bytes_accessed = (
        2 * (batch * HIDDEN + HIDDEN * MID_PAD + MID_PAD * NUM_CLASSES)  # bf16
        + 4 * (MID_PAD + NUM_CLASSES)                                     # f32 biases
        + 4 * batch * NUM_CLASSES                                         # f32 out
    )
    return pl.CostEstimate(flops=flops, transcendentals=0,
                           bytes_accessed=bytes_accessed)


def _pack_params(w1, b1, w2, b2):
    """Pad MID 350->384 and cast HBM-resident operands to bf16."""
    w1p = jnp.pad(w1, ((0, 0), (0, MID_PAD - MID))).astype(jnp.bfloat16)
    b1p = jnp.pad(b1, (0, MID_PAD - MID)).reshape(1, MID_PAD).astype(jnp.float32)
    w2p = jnp.pad(w2, ((0, MID_PAD - MID), (0, 0))).astype(jnp.bfloat16)
    b2p = b2.reshape(1, NUM_CLASSES).astype(jnp.float32)
    return w1p, b1p, w2p, b2p


def _head_small(x_bf, w1p, b1p, w2p, b2p):
    """Gridless path: everything VMEM-resident, single kernel invocation."""
    batch = x_bf.shape[0]
    vmem = functools.partial(pl.BlockSpec, memory_space=pltpu.MemorySpace.VMEM)
    return pl.pallas_call(
        mlp_head_kernel,
        out_shape=jax.ShapeDtypeStruct((batch, NUM_CLASSES), jnp.float32),
        in_specs=[vmem(), vmem(), vmem(), vmem(), vmem()],
        out_specs=vmem(),
        cost_estimate=_cost_estimate(batch),
    )(x_bf, w1p, b1p, w2p, b2p)


def _head_tiled(x_bf, w1p, b1p, w2p, b2p, block_b):
    """Batch-tiled path: weights VMEM-resident, x/out pipelined, parallel axis."""
    batch = x_bf.shape[0]
    padded_b = pl.cdiv(batch, block_b) * block_b
    if padded_b != batch:
        x_bf = jnp.pad(x_bf, ((0, padded_b - batch), (0, 0)))
    out = pl.pallas_call(
        mlp_head_kernel,
        out_shape=jax.ShapeDtypeStruct((padded_b, NUM_CLASSES), jnp.float32),
        grid=(padded_b // block_b,),
        in_specs=[
            pl.BlockSpec((block_b, HIDDEN), lambda i: (i, 0)),
            pl.BlockSpec((HIDDEN, MID_PAD), lambda i: (0, 0)),
            pl.BlockSpec((1, MID_PAD), lambda i: (0, 0)),
            pl.BlockSpec((MID_PAD, NUM_CLASSES), lambda i: (0, 0)),
            pl.BlockSpec((1, NUM_CLASSES), lambda i: (0, 0)),
        ],
        out_specs=pl.BlockSpec((block_b, NUM_CLASSES), lambda i: (i, 0)),
        compiler_params=pltpu.CompilerParams(
            dimension_semantics=("parallel",)),
        cost_estimate=_cost_estimate(padded_b),
    )(x_bf, w1p, b1p, w2p, b2p)
    return out[:batch]


def train_model_head(x, w1, b1, w2, b2, *, block_b=128):
    """x: (B, 768) pooled BERT output -> logits (B, 3)."""
    # TODO(synk): if this head is called repeatedly, fuse it into the BERT
    #             pooler / keep the ~0.6 MB bf16 weights resident across calls
    #             instead of re-DMAing them per invocation.
    batch = x.shape[0]
    w1p, b1p, w2p, b2p = _pack_params(w1, b1, w2, b2)
    x_bf = x.astype(jnp.bfloat16)
    if batch <= block_b:
        return _head_small(x_bf, w1p, b1p, w2p, b2p)
    return _head_tiled(x_bf, w1p, b1p, w2p, b2p, block_b)


def reference_head_bf16(x, w1, b1, w2, b2):
    """Pure-JAX reference with identical numerics (bf16 operands, f32 acc)."""
    h = jnp.dot(x.astype(jnp.bfloat16), w1.astype(jnp.bfloat16),
                preferred_element_type=jnp.float32) + b1
    h = jnp.maximum(h, 0.0)
    return jnp.dot(h.astype(jnp.bfloat16), w2.astype(jnp.bfloat16),
                   preferred_element_type=jnp.float32) + b2


def reference_head_f32(x, w1, b1, w2, b2):
    h = jnp.maximum(x @ w1 + b1, 0.0)
    return h @ w2 + b2


if __name__ == "__main__":
    key = jax.random.PRNGKey(0)
    kx, kw1, kb1, kw2, kb2, kx2 = jax.random.split(key, 6)

    # Deterministic parameters (shapes of nn.Linear(768, 350), nn.Linear(350, 3)).
    w1 = jax.random.normal(kw1, (HIDDEN, MID), dtype=jnp.float32) * 0.02
    b1 = jax.random.normal(kb1, (MID,), dtype=jnp.float32) * 0.02
    w2 = jax.random.normal(kw2, (MID, NUM_CLASSES), dtype=jnp.float32) * 0.02
    b2 = jax.random.normal(kb2, (NUM_CLASSES,), dtype=jnp.float32) * 0.02

    # --- small-batch (gridless) path: B = 2, simulated BERT pooled output ---
    B_small = 2
    x_small = jax.random.normal(kx, (B_small, HIDDEN), dtype=jnp.float32)
    out_small = jax.block_until_ready(train_model_head(x_small, w1, b1, w2, b2))
    ref_small = reference_head_bf16(x_small, w1, b1, w2, b2)
    assert out_small.shape == (B_small, NUM_CLASSES)
    assert jnp.allclose(out_small, ref_small, atol=2e-3, rtol=2e-3)
    assert jnp.allclose(out_small, reference_head_f32(x_small, w1, b1, w2, b2),
                        atol=3e-2, rtol=3e-2)

    # --- batch-tiled (pipelined, megacore-parallel) path: B = 512 ---
    B_big = 512
    x_big = jax.random.normal(kx2, (B_big, HIDDEN), dtype=jnp.float32)
    out_big = jax.block_until_ready(
        train_model_head(x_big, w1, b1, w2, b2, block_b=128))
    ref_big = reference_head_bf16(x_big, w1, b1, w2, b2)
    assert out_big.shape == (B_big, NUM_CLASSES)
    assert jnp.allclose(out_big, ref_big, atol=2e-3, rtol=2e-3)

    print("KERNEL_OK")
</pallas_src>

<mosaic_0001>
module attributes {stable_mosaic.version = 11 : i64} {
  func.func @mlp_head_kernel(%arg0: memref<2x768xbf16, #tpu.memory_space<vmem>>, %arg1: memref<768x384xbf16, #tpu.memory_space<vmem>>, %arg2: memref<1x384xf32, #tpu.memory_space<vmem>>, %arg3: memref<384x3xbf16, #tpu.memory_space<vmem>>, %arg4: memref<1x3xf32, #tpu.memory_space<vmem>>, %arg5: memref<2x3xf32, #tpu.memory_space<vmem>>) attributes {dimension_semantics = [], scalar_prefetch = 0 : i64, scratch_operands = 0 : i64, tpu.core_type = #tpu.core_type<tc>} {
    %c0 = arith.constant 0 : index
    %c0_0 = arith.constant 0 : index
    %0 = vector.load %arg0[%c0, %c0_0] : memref<2x768xbf16, #tpu.memory_space<vmem>>, vector<2x768xbf16>
    %c0_1 = arith.constant 0 : index
    %c0_2 = arith.constant 0 : index
    %1 = vector.load %arg1[%c0_1, %c0_2] : memref<768x384xbf16, #tpu.memory_space<vmem>>, vector<768x384xbf16>
    %cst = arith.constant dense<0.000000e+00> : vector<2x384xf32>
    %2 = tpu.matmul %0, %1, %cst {dimension_numbers = #tpu.dot_dimension_numbers<[1], [0], [0], [1], [0, 0, 1, 1], [], []>} : vector<2x768xbf16>, vector<768x384xbf16>, vector<2x384xf32> -> vector<2x384xf32>
    %c0_3 = arith.constant 0 : index
    %c0_4 = arith.constant 0 : index
    %3 = vector.load %arg2[%c0_3, %c0_4] : memref<1x384xf32, #tpu.memory_space<vmem>>, vector<1x384xf32>
    %4 = vector.broadcast %3 : vector<1x384xf32> to vector<2x384xf32>
    %5 = arith.addf %2, %4 : vector<2x384xf32>
    %cst_5 = arith.constant 0.000000e+00 : f32
    %6 = vector.broadcast %cst_5 : f32 to vector<2x384xf32>
    %7 = arith.maximumf %5, %6 : vector<2x384xf32>
    %8 = arith.truncf %7 : vector<2x384xf32> to vector<2x384xbf16>
    %c0_6 = arith.constant 0 : index
    %c0_7 = arith.constant 0 : index
    %9 = vector.load %arg3[%c0_6, %c0_7] : memref<384x3xbf16, #tpu.memory_space<vmem>>, vector<384x3xbf16>
    %cst_8 = arith.constant dense<0.000000e+00> : vector<2x3xf32>
    %10 = tpu.matmul %8, %9, %cst_8 {dimension_numbers = #tpu.dot_dimension_numbers<[1], [0], [0], [1], [0, 0, 1, 1], [], []>} : vector<2x384xbf16>, vector<384x3xbf16>, vector<2x3xf32> -> vector<2x3xf32>
    %c0_9 = arith.constant 0 : index
    %c0_10 = arith.constant 0 : index
    %11 = vector.load %arg4[%c0_9, %c0_10] : memref<1x3xf32, #tpu.memory_space<vmem>>, vector<1x3xf32>
    %12 = vector.broadcast %11 : vector<1x3xf32> to vector<2x3xf32>
    %13 = arith.addf %10, %12 : vector<2x3xf32>
    %c0_11 = arith.constant 0 : index
    %c0_12 = arith.constant 0 : index
    %14 = vector.load %arg5[%c0_11, %c0_12] : memref<2x3xf32, #tpu.memory_space<vmem>>, vector<2x3xf32>
    tpu.vector_store %arg5[%c0_11, %c0_12], %13 {strides = array<i32>} : memref<2x3xf32, #tpu.memory_space<vmem>>, vector<2x3xf32>,
    return
  }
}

</mosaic_0001>

<bundles_post_ra>
// kernel: tpu_custom_call.1
= control target key start
LH: loop header
LB: loop body
LE: loop exit
PB: predicated region body
PF: predicated region fallthrough
CT: control target
= control target key end

     0   :  { %10 = vsyncpa [#allocation3], 0  ;;  %s2327_s0 = inlined_call_operand.vmem [shape: bf16[2,768], index: 0, kind: input, shape index: {}]   ;;  %s2328_s1 = inlined_call_operand.hbm [shape: bf16[768,384], index: 1, kind: input, shape index: {}]   ;;  %s2329_s2 = inlined_call_operand.vmem [shape: f32[1,384], index: 2, kind: input, shape index: {}]   ;;  %s2330_s3 = inlined_call_operand.vmem [shape: bf16[384,3], index: 3, kind: input, shape index: {}]   ;;  %s2331_s4 = inlined_call_operand.vmem [shape: f32[1,3], index: 4, kind: input, shape index: {}]   ;;  %s2332_s5 = inlined_call_operand.hbm [shape: f32[2,3], index: 5, kind: output, shape index: {}]  }
   0x1   :  { %11 = vsyncpa [#allocation4], 0  ;;  %s2167_s18 = smov [#allocation2]  }
   0x2   :  { %s19_s19 = sshll.u32 %s2167_s18, 4  ;;  %s20_s19 = int_to_ptr.vmem [resolvable:$true] %s19_s19 }
   0x3   :  { %s2131_s20 = scalar_lea.vmem %s20_s19, 18432  ;;  %p2136_p1 = scmp.lt.s32.totalorder %s20_s19, %s20_s19 }
   0x4   :  { %p2132_p0 = scmp.ne.s32.totalorder %s20_s19, %s2131_s20  ;;  %p2137_p2 = scmp.lt.s32.totalorder %s2131_s20, %s2131_s20 }
   0x6   :  { %p2138_p3 = por %p2137_p2, %p2136_p1 }
   0x8   :  { %p2139_p4 = pnand %p2138_p3, %p2132_p0 }
   0xa   :  { %2142 = shalt.err (!%p2139_p4)
}
   0xb   :  { %s2168_s21 = smov 192   ;;  %s2169_s22 = smov 12  }
   0xc   :  { %25 = dma.hbm_to_vmem [thread:$0]  %s2328_s1, 18432, %s20_s19, [#allocation3], %s2168_s21, %s2168_s21, %s2169_s22  }
   0xd   :  { %2163 = dma.done.wait [#allocation3], 18432  }
   0xe   :  { %2164 = vsyncadd [#allocation3], 4294948864  ;;  %v1906_v0 = vld [vmem:[#allocation2 + $0xac] ss:$12 sps:$4 sm:$0xff]   ;;  %v1910_v2 = vld [vmem:[#allocation2 + $0xa8] ss:$12 sps:$4 sm:$0xff]   ;;  %v231_v36 = vlaneseq }
   0xf   :  { %v1908_v1 = vld [vmem:[#allocation2 + $0x22c] ss:$12 sps:$4 sm:$0xff]   ;;  %1068 = vmatprep.subr.bf16.mxu0 %v1906_v0  ;;  %v1911_v3 = vld [vmem:[#allocation2 + $0x228] ss:$12 sps:$4 sm:$0xff]   ;;  %v1916_v6 = vld [vmem:[#allocation2 + $0x90] ss:$12 sps:$4 sm:$0xff]  }
  0x10   :  { %1109 = vmatprep.subr.bf16.mxu1 %v1908_v1  ;;  %v1912_v4 = vld [vmem:[#allocation2 + $0x94] ss:$12 sps:$4 sm:$0xff]   ;;  %1069 = vmatpush1.bf16.msra.mxu0 %v1910_v2  ;;  %v1917_v7 = vld [vmem:[#allocation2 + $0x210] ss:$12 sps:$4 sm:$0xff]   ;;  %v1922_v10 = vld [vmem:[#allocation2 + $0x78] ss:$12 sps:$4 sm:$0xff]  }
  0x11   :  { %1110 = vmatpush1.bf16.msra.mxu1 %v1911_v3  ;;  %v1914_v5 = vld [vmem:[#allocation2 + $0x214] ss:$12 sps:$4 sm:$0xff]   ;;  %1070 = vmatprep.subr.bf16.mxu0 %v1912_v4  ;;  %v1918_v8 = vld [vmem:[#allocation2 + $0x7c] ss:$12 sps:$4 sm:$0xff]   ;;  %v1923_v11 = vld [vmem:[#allocation2 + $0x1f8] ss:$12 sps:$4 sm:$0xff]  }
  0x12   :  { %1111 = vmatprep.subr.bf16.mxu1 %v1914_v5  ;;  %v1920_v9 = vld [vmem:[#allocation2 + $0x1fc] ss:$12 sps:$4 sm:$0xff]   ;;  %v1924_v12 = vld [vmem:[#allocation2 + $0x64] ss:$12 sps:$4 sm:$0xff]   ;;  %v1928_v14 = vld [vmem:[#allocation2 + $0x60] ss:$12 sps:$4 sm:$0xff]  }
  0x13   :  { %v1926_v13 = vld [vmem:[#allocation2 + $0x1e4] ss:$12 sps:$4 sm:$0xff]   ;;  %v1929_v15 = vld [vmem:[#allocation2 + $0x1e0] ss:$12 sps:$4 sm:$0xff]   ;;  %v1934_v18 = vld [vmem:[#allocation2 + $0x48] ss:$12 sps:$4 sm:$0xff]  }
  0x14   :  { %1071 = vmatpush1.bf16.msra.mxu0 %v1916_v6  ;;  %v1930_v16 = vld [vmem:[#allocation2 + $0x4c] ss:$12 sps:$4 sm:$0xff]   ;;  %v1935_v19 = vld [vmem:[#allocation2 + $0x1c8] ss:$12 sps:$4 sm:$0xff]   ;;  %v1940_v22 = vld [vmem:[#allocation2 + $0x30] ss:$12 sps:$4 sm:$0xff]  }
  0x15   :  { %1112 = vmatpush1.bf16.msra.mxu1 %v1917_v7  ;;  %1072 = vmatprep.subr.bf16.mxu0 %v1918_v8  ;;  %v1932_v17 = vld [vmem:[#allocation2 + $0x1cc] ss:$12 sps:$4 sm:$0xff]   ;;  %v1936_v20 = vld [vmem:[#allocation2 + $0x34] ss:$12 sps:$4 sm:$0xff]   ;;  %v1941_v23 = vld [vmem:[#allocation2 + $0x1b0] ss:$12 sps:$4 sm:$0xff]  }
  0x16   :  { %1113 = vmatprep.subr.bf16.mxu1 %v1920_v9  ;;  %v1938_v21 = vld [vmem:[#allocation2 + $0x1b4] ss:$12 sps:$4 sm:$0xff]   ;;  %v1942_v24 = vld [vmem:[#allocation2 + $0x1c] ss:$12 sps:$4 sm:$0xff]   ;;  %v1946_v26 = vld [vmem:[#allocation2 + $0x18] ss:$12 sps:$4 sm:$0xff]  }
  0x17   :  { %v1944_v25 = vld [vmem:[#allocation2 + $0x19c] ss:$12 sps:$4 sm:$0xff]   ;;  %v1947_v27 = vld [vmem:[#allocation2 + $0x198] ss:$12 sps:$4 sm:$0xff]   ;;  %v1952_v30 = vld [vmem:[#allocation2] ss:$12 sps:$4 sm:$0xff]  }
  0x18   :  { %1073 = vmatpush1.bf16.msra.mxu0 %v1922_v10  ;;  %v1948_v28 = vld [vmem:[#allocation2 + $0x4] ss:$12 sps:$4 sm:$0xff]   ;;  %v1953_v31 = vld [vmem:[#allocation2 + $0x180] ss:$12 sps:$4 sm:$0xff]   ;;  %v1958_v34 = vld [vmem:[#allocation2 + $0x168] ss:$12 sps:$4 sm:$0xff]  }
  0x19   :  { %1114 = vmatpush1.bf16.msra.mxu1 %v1923_v11  ;;  %1074 = vmatprep.subr.bf16.mxu0 %v1924_v12  ;;  %v1950_v29 = vld [vmem:[#allocation2 + $0x184] ss:$12 sps:$4 sm:$0xff]   ;;  %v1954_v32 = vld [vmem:[#allocation2 + $0x16c] ss:$12 sps:$4 sm:$0xff]   ;;  %v1959_v35 = vld [vmem:[#allocation2 + $0x2e8] ss:$12 sps:$4 sm:$0xff]  }
  0x1a   :  { %1115 = vmatprep.subr.bf16.mxu1 %v1926_v13  ;;  %v1956_v33 = vld [vmem:[#allocation2 + $0x2ec] ss:$12 sps:$4 sm:$0xff]   ;;  %v2170_v37 = vmov 1966171168   ;;  %v1960_v39 = vld [vmem:[#allocation2 + $0x154] ss:$12 sps:$4 sm:$0xff]  }
  0x1b   :  { %v249_v38 = vunpack.c.l.s4 %v2170_v37  ;;  %v1962_v40 = vld [vmem:[#allocation2 + $0x2d4] ss:$12 sps:$4 sm:$0xff]   ;;  %v1964_v41 = vld [vmem:[#allocation2 + $0x150] ss:$12 sps:$4 sm:$0xff]   ;;  %v2207_v42 = vshrl.u32 %v231_v36, 7  ;;  %vm2172_vm0 = vmmov 0  }
  0x1c   :  { %1075 = vmatpush1.bf16.msra.mxu0 %v1928_v14  ;;  %v1965_v44 = vld [vmem:[#allocation2 + $0x2d0] ss:$12 sps:$4 sm:$0xff]   ;;  %v1970_v47 = vld [vmem:[#allocation2 + $0x138] ss:$12 sps:$4 sm:$0xff]   ;;  %v1976_v52 = vld [vmem:[#allocation2 + $0x120] ss:$12 sps:$4 sm:$0xff]  }
  0x1d   :  { %1116 = vmatpush1.bf16.msra.mxu1 %v1929_v15  ;;  %1076 = vmatprep.subr.bf16.mxu0 %v1930_v16  ;;  %v250_v43 = vunpack.c.0.s8 %v249_v38  ;;  %v1966_v45 = vld [vmem:[#allocation2 + $0x13c] ss:$12 sps:$4 sm:$0xff]   ;;  %v1971_v48 = vld [vmem:[#allocation2 + $0x2b8] ss:$12 sps:$4 sm:$0xff]   ;;  %v1977_v54 = vld [vmem:[#allocation2 + $0x2a0] ss:$12 sps:$4 sm:$0xff]  }
  0x1e   :  { %1117 = vmatprep.subr.bf16.mxu1 %v1932_v17  ;;  %v1968_v46 = vld [vmem:[#allocation2 + $0x2bc] ss:$12 sps:$4 sm:$0xff]   ;;  %v1972_v50 = vld [vmem:[#allocation2 + $0x124] ss:$12 sps:$4 sm:$0xff]   ;;  %v1978_v57 = vld [vmem:[#allocation2 + $0x10c] ss:$12 sps:$4 sm:$0xff]  }
  0x1f   :  { %v2210_v49 = vsub.s32 %v250_v43, %v2207_v42  ;;  %v1974_v51 = vld [vmem:[#allocation2 + $0x2a4] ss:$12 sps:$4 sm:$0xff]   ;;  %v1980_v58 = vld [vmem:[#allocation2 + $0x28c] ss:$12 sps:$4 sm:$0xff]   ;;  %v1982_v61 = vld [vmem:[#allocation2 + $0x108] ss:$12 sps:$4 sm:$0xff]  }
  0x20   :  { %1077 = vmatpush1.bf16.msra.mxu0 %v1934_v18  ;;  %v36_v53 = vld [vmem:[%s2327_s0] sm:$0x3f]  ;;  %v1983_v62 = vld [vmem:[#allocation2 + $0x288] ss:$12 sps:$4 sm:$0xff]   ;;  %v1988_v4 = vld [vmem:[#allocation2 + $0xf0] ss:$12 sps:$4 sm:$0xff]  }
  0x21   :  { %1118 = vmatpush1.bf16.msra.mxu1 %v1935_v19  ;;  %1078 = vmatprep.subr.bf16.mxu0 %v1936_v20  ;;  %v254_v55 = vrot.slane %v36_v53, %v2210_v49  ;;  %v247_v56 = vcombine.high %v36_v53, %v36_v53  ;;  %v1984_v1 = vld [vmem:[#allocation2 + $0xf4] ss:$12 sps:$4 sm:$0xff]   ;;  %v1989_v5 = vld [vmem:[#allocation2 + $0x270] ss:$12 sps:$4 sm:$0xff]   ;;  %v1994_v8 = vld [vmem:[#allocation2 + $0xd8] ss:$12 sps:$4 sm:$0xff]  }
  0x22   :  { %1119 = vmatprep.subr.bf16.mxu1 %v1938_v21  ;;  %v1986_v2 = vld [vmem:[#allocation2 + $0x274] ss:$12 sps:$4 sm:$0xff]   ;;  %v1990_v6 = vld [vmem:[#allocation2 + $0xdc] ss:$12 sps:$4 sm:$0xff]   ;;  %v1995_v9 = vld [vmem:[#allocation2 + $0x258] ss:$12 sps:$4 sm:$0xff]  }
  0x23   :  { %v262_v59 = vcombine.high %v254_v55, %v254_v55  ;;  %v261_v60 = vrot.slane %v247_v56, %v2210_v49  ;;  %v1992_v7 = vld [vmem:[#allocation2 + $0x25c] ss:$12 sps:$4 sm:$0xff]   ;;  %v1996_v10 = vld [vmem:[#allocation2 + $0xc4] ss:$12 sps:$4 sm:$0xff]   ;;  %v2000_v12 = vld [vmem:[#allocation2 + $0xc0] ss:$12 sps:$4 sm:$0xff]   ;;  %v2225_v13 = vrot.slane %v254_v55, %v2210_v49 }
  0x24   :  { %1079 = vmatpush1.bf16.msra.mxu0 %v1940_v22  ;;  %v1998_v11 = vld [vmem:[#allocation2 + $0x244] ss:$12 sps:$4 sm:$0xff]   ;;  %v2001_v14 = vld [vmem:[#allocation2 + $0x240] ss:$12 sps:$4 sm:$0xff]   ;;  %v2002_v17 = vld [vmem:[#allocation2 + $0x3a8] ss:$12 sps:$4 sm:$0xff]  }
  0x25   :  { %1120 = vmatpush1.bf16.msra.mxu1 %v1941_v23  ;;  %1080 = vmatprep.subr.bf16.mxu0 %v1942_v24  ;;  %v284_v63 = vrot.slane %v262_v59, %v2210_v49  ;;  %v2219_v0 = vrot.slane %v261_v60, %v2210_v49  ;;  %v2004_v15 = vld [vmem:[#allocation2 + $0x3ac] ss:$12 sps:$4 sm:$0xff]   ;;  %v2005_v16 = vld [vmem:[#allocation2 + $0x170] ss:$12 sps:$4 sm:$0xff]   ;;  %v263_v18 = vcombine.high %v261_v60, %v261_v60  ;;  %v2009_v21 = vld [vmem:[#allocation2 + $0x394] ss:$12 sps:$4 sm:$0xff]  }
  0x26   :  { %1121 = vmatprep.subr.bf16.mxu1 %v1944_v25  ;;  %v2229_v19 = vcombine.high %v2225_v13, %v2225_v13  ;;  %v2006_v20 = vld [vmem:[#allocation2 + $0xb0] ss:$12 sps:$4 sm:$0xff]   ;;  %v2010_v22 = vld [vmem:[#allocation2 + $0x158] ss:$12 sps:$4 sm:$0xff]   ;;  %v2022_v36 = vld [vmem:[#allocation2 + $0x348] ss:$12 sps:$4 sm:$0xff]  }
  0x27   :  { %v2221_v3 = vcombine.high %v284_v63, %v284_v63  ;;  %1100 = vmatprep.mubr.bf16.mxu0 %v284_v63  ;;  %v2232_v23 = vrot.slane %v263_v18, %v2210_v49  ;;  %v2007_v24 = vld [vmem:[#allocation2 + $0x390] ss:$12 sps:$4 sm:$0xff]   ;;  %v2011_v25 = vld [vmem:[#allocation2 + $0x98] ss:$12 sps:$4 sm:$0xff]   ;;  %v2029_v38 = vld [vmem:[#allocation2 + $0x334] ss:$12 sps:$4 sm:$0xff]  }
  0x28   :  { %1081 = vmatpush1.bf16.msra.mxu0 %v1946_v26  ;;  %v2014_v26 = vld [vmem:[#allocation2 + $0x37c] ss:$12 sps:$4 sm:$0xff]   ;;  %v2037_v49 = vld [vmem:[#allocation2 + $0x300] ss:$12 sps:$4 sm:$0xff]   ;;  %v2050_v56 = vld [vmem:[#allocation2 + $0x2d8] ss:$12 sps:$4 sm:$0xff]  }
  0x29   :  { %1122 = vmatpush1.bf16.msra.mxu1 %v1947_v27  ;;  %1082 = vmatprep.subr.bf16.mxu0 %v1948_v28  ;;  %v2015_v27 = vld [vmem:[#allocation2 + $0x140] ss:$12 sps:$4 sm:$0xff]   ;;  %v2012_v28 = vld [vmem:[#allocation2 + $0x378] ss:$12 sps:$4 sm:$0xff]   ;;  %v2026_v37 = vld [vmem:[#allocation2 + $0x50] ss:$12 sps:$4 sm:$0xff]  }
  0x2a   :  { %1123 = vmatprep.subr.bf16.mxu1 %v1950_v29  ;;  %1141 = vmatprep.mubr.bf16.mxu1 %v2221_v3  ;;  %v2016_v29 = vld [vmem:[#allocation2 + $0x80] ss:$12 sps:$4 sm:$0xff]   ;;  %v2034_v43 = vld [vmem:[#allocation2 + $0x31c] ss:$12 sps:$4 sm:$0xff]   ;;  %s2173_s23 = smov [#allocation5]   ;;  %vm1596_vm1 = vcmask 17408  }
  0x2b   :  { %v2042_v53 = vld [vmem:[#allocation2 + $0x468] ss:$12 sps:$4 sm:$0xff]   ;;  %v2055_v60 = vld [vmem:[#allocation2 + $0x2c0] ss:$12 sps:$4 sm:$0xff]   ;;  %s1604_s24 = sshll.u32 %s2173_s23, 4  ;;  %s1605_s24 = int_to_ptr.vmem [resolvable:$true] %s1604_s24 }
  0x2c   :  { %1083 = vmatpush1.bf16.msra.mxu0 %v1952_v30  ;;  %v2019_v30 = vld [vmem:[#allocation2 + $0x364] ss:$12 sps:$4 sm:$0xff]   ;;  %v2049_v55 = vld [vmem:[#allocation2 + $0x454] ss:$12 sps:$4 sm:$0xff]   ;;  %v2054_v59 = vld [vmem:[#allocation2 + $0x43c] ss:$12 sps:$4 sm:$0xff]   ;;  %p2148_p6 = scmp.lt.s32.totalorder %s1605_s24, %s1605_s24 }
  0x2d   :  { %1124 = vmatpush1.bf16.msra.mxu1 %v1953_v31  ;;  %1084 = vmatprep.subr.bf16.mxu0 %v1954_v32  ;;  %v2020_v31 = vld [vmem:[#allocation2 + $0x128] ss:$12 sps:$4 sm:$0xff]   ;;  %v2017_v32 = vld [vmem:[#allocation2 + $0x360] ss:$12 sps:$4 sm:$0xff]   ;;  %s2143_s1 = scalar_lea.vmem %s1605_s24, 32 }
  0x2e   :  { %1125 = vmatprep.subr.bf16.mxu1 %v1956_v33  ;;  %v2021_v33 = vld [vmem:[#allocation2 + $0x68] ss:$12 sps:$4 sm:$0xff]   ;;  %v2077_v18 = vld [vmem:[#allocation2 + $0x3c0] ss:$12 sps:$4 sm:$0xff]   ;;  %p2144_p5 = scmp.ne.s32.totalorder %s1605_s24, %s2143_s1  ;;  %p2149_p7 = scmp.lt.s32.totalorder %s2143_s1, %s2143_s1 }
  0x30   :  { %1085 = vmatpush2.bf16.msra.mxu0 %v1958_v34  ;;  %v2024_v34 = vld [vmem:[#allocation2 + $0x34c] ss:$12 sps:$4 sm:$0xff]   ;;  %p2150_p8 = por %p2149_p7, %p2148_p6 }
  0x31   :  { %1126 = vmatpush2.bf16.msra.mxu1 %v1959_v35  ;;  %1086 = vmatprep.subr.bf16.mxu0 %v1960_v39  ;;  %v2025_v35 = vld [vmem:[#allocation2 + $0x110] ss:$12 sps:$4 sm:$0xff]   ;;  %v2030_v39 = vld [vmem:[#allocation2 + $0xf8] ss:$12 sps:$4 sm:$0xff]  }
  0x32   :  { %1127 = vmatprep.subr.bf16.mxu1 %v1962_v40  ;;  %v2027_v40 = vld [vmem:[#allocation2 + $0x330] ss:$12 sps:$4 sm:$0xff]   ;;  %p2151_p9 = pnand %p2150_p8, %p2144_p5 }
  0x34   :  { %1087 = vmatpush2.bf16.msra.mxu0 %v1964_v41  ;;  %v2031_v41 = vld [vmem:[#allocation2 + $0x38] ss:$12 sps:$4 sm:$0xff]  }
  0x35   :  { %1128 = vmatpush2.bf16.msra.mxu1 %v1965_v44  ;;  %1088 = vmatprep.subr.bf16.mxu0 %v1966_v45  ;;  %v2035_v44 = vld [vmem:[#allocation2 + $0xe0] ss:$12 sps:$4 sm:$0xff]   ;;  %v2032_v45 = vld [vmem:[#allocation2 + $0x318] ss:$12 sps:$4 sm:$0xff]  }
  0x36   :  { %1129 = vmatprep.subr.bf16.mxu1 %v1968_v46  ;;  %v2036_v46 = vld [vmem:[#allocation2 + $0x20] ss:$12 sps:$4 sm:$0xff]  }
  0x38   :  { %1089 = vmatpush2.bf16.msra.mxu0 %v1970_v47  ;;  %v2039_v47 = vld [vmem:[#allocation2 + $0x304] ss:$12 sps:$4 sm:$0xff]  }
  0x39   :  { %1130 = vmatpush2.bf16.msra.mxu1 %v1971_v48  ;;  %1090 = vmatprep.subr.bf16.mxu0 %v1972_v50  ;;  %v2040_v48 = vld [vmem:[#allocation2 + $0xc8] ss:$12 sps:$4 sm:$0xff]  }
  0x3a   :  { %1131 = vmatprep.subr.bf16.mxu1 %v1974_v51  ;;  %v2041_v50 = vld [vmem:[#allocation2 + $0x8] ss:$12 sps:$4 sm:$0xff]   ;;  %v2044_v51 = vld [vmem:[#allocation2 + $0x46c] ss:$12 sps:$4 sm:$0xff]  }
  0x3c   :  { %1091 = vmatpush2.bf16.msra.mxu0 %v1976_v52  ;;  %v2045_v52 = vld [vmem:[#allocation2 + $0x2f0] ss:$12 sps:$4 sm:$0xff]  }
  0x3d   :  { %1132 = vmatpush2.bf16.msra.mxu1 %v1977_v54  ;;  %1092 = vmatprep.subr.bf16.mxu0 %v1978_v57  ;;  %v2046_v54 = vld [vmem:[#allocation2 + $0x230] ss:$12 sps:$4 sm:$0xff]  }
  0x3e   :  { %1133 = vmatprep.subr.bf16.mxu1 %v1980_v58  ;;  %v2047_v57 = vld [vmem:[#allocation2 + $0x450] ss:$12 sps:$4 sm:$0xff]   ;;  %v2051_v58 = vld [vmem:[#allocation2 + $0x218] ss:$12 sps:$4 sm:$0xff]  }
  0x40   :  { %1093 = vmatpush2.bf16.msra.mxu0 %v1982_v61  ;;  %v2052_v61 = vld [vmem:[#allocation2 + $0x438] ss:$12 sps:$4 sm:$0xff]  }
  0x41   :  { %1134 = vmatpush2.bf16.msra.mxu1 %v1983_v62  ;;  %1094 = vmatprep.subr.bf16.mxu0 %v1984_v1  ;;  %v2056_v62 = vld [vmem:[#allocation2 + $0x200] ss:$12 sps:$4 sm:$0xff]   ;;  %v2060_v1 = vld [vmem:[#allocation2 + $0x2a8] ss:$12 sps:$4 sm:$0xff]  }
  0x42   :  { %1135 = vmatprep.subr.bf16.mxu1 %v1986_v2  ;;  %v2057_v2 = vld [vmem:[#allocation2 + $0x420] ss:$12 sps:$4 sm:$0xff]  }
  0x44   :  { %1095 = vmatpush2.bf16.msra.mxu0 %v1988_v4  ;;  %v2061_v4 = vld [vmem:[#allocation2 + $0x1e8] ss:$12 sps:$4 sm:$0xff]  }
  0x45   :  { %1136 = vmatpush2.bf16.msra.mxu1 %v1989_v5  ;;  %1096 = vmatprep.subr.bf16.mxu0 %v1990_v6  ;;  %v2064_v5 = vld [vmem:[#allocation2 + $0x40c] ss:$12 sps:$4 sm:$0xff]   ;;  %v2065_v6 = vld [vmem:[#allocation2 + $0x290] ss:$12 sps:$4 sm:$0xff]  }
  0x46   :  { %1137 = vmatprep.subr.bf16.mxu1 %v1992_v7  ;;  %v2062_v7 = vld [vmem:[#allocation2 + $0x408] ss:$12 sps:$4 sm:$0xff]  }
  0x48   :  { %1097 = vmatpush2.bf16.msra.mxu0 %v1994_v8  ;;  %v2066_v8 = vld [vmem:[#allocation2 + $0x1d0] ss:$12 sps:$4 sm:$0xff]  }
  0x49   :  { %1138 = vmatpush2.bf16.msra.mxu1 %v1995_v9  ;;  %1098 = vmatprep.subr.bf16.mxu0 %v1996_v10  ;;  %v2070_v9 = vld [vmem:[#allocation2 + $0x278] ss:$12 sps:$4 sm:$0xff]   ;;  %v2067_v10 = vld [vmem:[#allocation2 + $0x3f0] ss:$12 sps:$4 sm:$0xff]  }
  0x4a   :  { %1139 = vmatprep.subr.bf16.mxu1 %v1998_v11  ;;  %v2071_v11 = vld [vmem:[#allocation2 + $0x1b8] ss:$12 sps:$4 sm:$0xff]  }
  0x4c   :  { %1099 = vmatpush2.bf16.msra.mxu0 %v2000_v12  ;;  %v2074_v12 = vld [vmem:[#allocation2 + $0x3dc] ss:$12 sps:$4 sm:$0xff]  }
  0x4d   :  { %1140 = vmatpush2.bf16.msra.mxu1 %v2001_v14  ;;  %1150 = vmatprep.subr.bf16.mxu0 %v2004_v15  ;;  %v2072_v14 = vld [vmem:[#allocation2 + $0x3d8] ss:$12 sps:$4 sm:$0xff]   ;;  %v2076_v15 = vld [vmem:[#allocation2 + $0x1a0] ss:$12 sps:$4 sm:$0xff]  }
  0x4e   :  { %1782 = vmatprep.subr.bf16.mxu1 %v2005_v16  ;;  %v2079_v16 = vld [vmem:[#allocation2 + $0x3c4] ss:$12 sps:$4 sm:$0xff]  }
  0x4f   :  { %1101 = vmatmul.mubr.bf16.vlgmr.msra.gmra.mxu0 %v2225_v13 }
  0x50   :  { %1142 = vmatmul.mubr.bf16.vlgmr.msra.gmra.mxu1 %v2229_v19  ;;  %1151 = vmatpush1.bf16.msra.mxu0 %v2002_v17  ;;  %v2080_v17 = vld [vmem:[#allocation2 + $0x248] ss:$12 sps:$4 sm:$0xff]  }
  0x51   :  { %1783 = vmatpush3.bf16.msra.mxu1 %v2006_v20  ;;  %1152 = vmatprep.subr.bf16.mxu0 %v2009_v21  ;;  %v2081_v20 = vld [vmem:[#allocation2 + $0x188] ss:$12 sps:$4 sm:$0xff]   ;;  %v2083_v21 = vld [vmem:[#allocation2 + $0x470] ss:$12 sps:$4 sm:$0xff]  }
  0x52   :  { %1784 = vmatprep.subr.bf16.mxu1 %v2010_v22  ;;  %1223 = vmatprep.mubr.bf16.mxu1 %v284_v63  ;;  %v2059_v63 = vld [vmem:[#allocation2 + $0x424] ss:$12 sps:$4 sm:$0xff]  }
  0x53   :  { %1182 = vmatprep.mubr.bf16.mxu0 %v2232_v23  ;;  %v2084_v22 = vld [vmem:[#allocation2 + $0x3b0] ss:$12 sps:$4 sm:$0xff]  }
  0x54   :  { %1153 = vmatpush1.bf16.msra.mxu0 %v2007_v24  ;;  %v2085_v24 = vld [vmem:[#allocation2 + $0x458] ss:$12 sps:$4 sm:$0xff]  }
  0x55   :  { %1785 = vmatpush3.bf16.msra.mxu1 %v2011_v25  ;;  %1154 = vmatprep.subr.bf16.mxu0 %v2014_v26  ;;  %v2086_v25 = vld [vmem:[#allocation2 + $0x398] ss:$12 sps:$4 sm:$0xff]   ;;  %v2087_v26 = vld [vmem:[#allocation2 + $0x440] ss:$12 sps:$4 sm:$0xff]  }
  0x56   :  { %1786 = vmatprep.subr.bf16.mxu1 %v2015_v27  ;;  %v2088_v27 = vld [vmem:[#allocation2 + $0x380] ss:$12 sps:$4 sm:$0xff]  }
  0x58   :  { %1155 = vmatpush1.bf16.msra.mxu0 %v2012_v28  ;;  %v2089_v28 = vld [vmem:[#allocation2 + $0x428] ss:$12 sps:$4 sm:$0xff]  }
  0x59   :  { %1787 = vmatpush3.bf16.msra.mxu1 %v2016_v29  ;;  %1156 = vmatprep.subr.bf16.mxu0 %v2019_v30  ;;  %v2099_v29 = vld [vmem:[%s2330_s3 + $0x78] sm:$0xff]  }
  0x5a   :  { %1788 = vmatprep.subr.bf16.mxu1 %v2020_v31  ;;  %v2100_v30 = vld [vmem:[%s2330_s3 + $0x38] sm:$0xff]   ;;  %v2102_v31 = vld [vmem:[%s2330_s3 + $0x30] sm:$0xff]  }
  0x5c   :  { %1157 = vmatpush1.bf16.msra.mxu0 %v2017_v32  ;;  %v2091_v32 = vld [vmem:[#allocation2 + $0x410] ss:$12 sps:$4 sm:$0xff]  }
  0x5d   :  { %1789 = vmatpush3.bf16.msra.mxu1 %v2021_v33  ;;  %1158 = vmatprep.subr.bf16.mxu0 %v2024_v34  ;;  %v2103_v33 = vld [vmem:[%s2330_s3 + $0x68] sm:$0xff]   ;;  %v2092_v34 = vld [vmem:[#allocation2 + $0x350] ss:$12 sps:$4 sm:$0xff]  }
  0x5e   :  { %1790 = vmatprep.subr.bf16.mxu1 %v2025_v35  ;;  %v2104_v35 = vld [vmem:[%s2330_s3 + $0x28] sm:$0xff]  }
  0x60   :  { %1159 = vmatpush1.bf16.msra.mxu0 %v2022_v36  ;;  %v2093_v36 = vld [vmem:[#allocation2 + $0x3f8] ss:$12 sps:$4 sm:$0xff]  }
  0x61   :  { %1791 = vmatpush3.bf16.msra.mxu1 %v2026_v37  ;;  %1160 = vmatprep.subr.bf16.mxu0 %v2029_v38  ;;  %v2105_v37 = vld [vmem:[%s2330_s3 + $0x60] sm:$0xff]  }
  0x62   :  { %1792 = vmatprep.subr.bf16.mxu1 %v2030_v39  ;;  %v2094_v38 = vld [vmem:[#allocation2 + $0x338] ss:$12 sps:$4 sm:$0xff]  }
  0x63   :  { %v2106_v39 = vld [vmem:[%s2330_s3 + $0x20] sm:$0xff]  }
  0x64   :  { %1161 = vmatpush1.bf16.msra.mxu0 %v2027_v40  ;;  %v2095_v40 = vld [vmem:[#allocation2 + $0x3e0] ss:$12 sps:$4 sm:$0xff]  }
  0x65   :  { %1793 = vmatpush3.bf16.msra.mxu1 %v2031_v41  ;;  %1162 = vmatprep.subr.bf16.mxu0 %v2034_v43  ;;  %v2096_v41 = vld [vmem:[#allocation2 + $0x320] ss:$12 sps:$4 sm:$0xff]   ;;  %v2097_v43 = vld [vmem:[#allocation2 + $0x3c8] ss:$12 sps:$4 sm:$0xff]  }
  0x66   :  { %1794 = vmatprep.subr.bf16.mxu1 %v2035_v44  ;;  %v2098_v44 = vld [vmem:[#allocation2 + $0x308] ss:$12 sps:$4 sm:$0xff]  }
  0x68   :  { %1163 = vmatpush1.bf16.msra.mxu0 %v2032_v45  ;;  %v2107_v45 = vld [vmem:[%s2330_s3 + $0x58] sm:$0xff]  }
  0x69   :  { %1795 = vmatpush3.bf16.msra.mxu1 %v2036_v46  ;;  %1164 = vmatprep.subr.bf16.mxu0 %v2039_v47  ;;  %v2108_v46 = vld [vmem:[%s2330_s3 + $0x18] sm:$0xff]   ;;  %v2109_v47 = vld [vmem:[%s2330_s3 + $0x50] sm:$0xff]  }
  0x6a   :  { %1796 = vmatprep.subr.bf16.mxu1 %v2040_v48  ;;  %v2110_v48 = vld [vmem:[%s2330_s3 + $0x10] sm:$0xff]  }
  0x6c   :  { %1165 = vmatpush1.bf16.msra.mxu0 %v2037_v49  ;;  %v2112_v49 = vld [vmem:[%s2330_s3 + $0x8] sm:$0xff]  }
  0x6d   :  { %1797 = vmatpush3.bf16.msra.mxu1 %v2041_v50  ;;  %1166 = vmatprep.subr.bf16.mxu0 %v2044_v51  ;;  %v2113_v50 = vld [vmem:[%s2330_s3 + $0x40] sm:$0xff]  }
  0x6e   :  { %1804 = vmatprep.subr.bf16.mxu1 %v2045_v52  ;;  %v2114_v51 = vld [vmem:[%s2330_s3] sm:$0xff]   ;;  %v2115_v52 = vld [vmem:[%s2330_s3 + $0xb8] sm:$0xff]  }
  0x70   :  { %1224 = vmatmul.mubr.bf16.vlgmr.msra.gmra.mxu1 %v2225_v13  ;;  %1167 = vmatpush2.bf16.msra.mxu0 %v2042_v53  ;;  %v2075_v13 = vld [vmem:[#allocation2 + $0x260] ss:$12 sps:$4 sm:$0xff]   ;;  %v2171_v53 = vmov 0.0  }
  0x71   :  { %1805 = vmatpush3.bf16.msra.mxu1 %v2046_v54  ;;  %1168 = vmatprep.subr.bf16.mxu0 %v2049_v55  ;;  %v2116_v54 = vld [vmem:[%s2330_s3 + $0xb0] sm:$0xff]   ;;  %v2117_v55 = vld [vmem:[%s2330_s3 + $0xa8] sm:$0xff]  }
  0x72   :  { %1806 = vmatprep.subr.bf16.mxu1 %v2050_v56  ;;  %1263 = vmatprep.mubr.bf16.mxu1 %v2221_v3  ;;  %v2069_v3 = vld [vmem:[#allocation2 + $0x3f4] ss:$12 sps:$4 sm:$0xff]  }
  0x73   :  { %v2118_v56 = vld [vmem:[%s2330_s3 + $0xa0] sm:$0xff]  }
  0x74   :  { %1169 = vmatpush2.bf16.msra.mxu0 %v2047_v57  ;;  %v2119_v57 = vld [vmem:[%s2330_s3 + $0x98] sm:$0xff]  }
  0x75   :  { %1807 = vmatpush3.bf16.msra.mxu1 %v2051_v58  ;;  %1170 = vmatprep.subr.bf16.mxu0 %v2054_v59  ;;  %v2120_v58 = vld [vmem:[%s2330_s3 + $0x90] sm:$0xff]   ;;  %v2121_v59 = vld [vmem:[%s2330_s3 + $0x88] sm:$0xff]  }
  0x76   :  { %1808 = vmatprep.subr.bf16.mxu1 %v2055_v60  ;;  %v2122_v60 = vld [vmem:[%s2330_s3 + $0x80] sm:$0xff]  }
  0x78   :  { %1171 = vmatpush2.bf16.msra.mxu0 %v2052_v61 }
  0x79   :  { %1809 = vmatpush3.bf16.msra.mxu1 %v2056_v62  ;;  %1172 = vmatprep.subr.bf16.mxu0 %v2059_v63 }
  0x7a   :  { %1810 = vmatprep.subr.bf16.mxu1 %v2060_v1 }
  0x7c   :  { %1173 = vmatpush2.bf16.msra.mxu0 %v2057_v2 }
  0x7d   :  { %1811 = vmatpush3.bf16.msra.mxu1 %v2061_v4  ;;  %1174 = vmatprep.subr.bf16.mxu0 %v2064_v5 }
  0x7e   :  { %1812 = vmatprep.subr.bf16.mxu1 %v2065_v6 }
  0x80   :  { %1175 = vmatpush2.bf16.msra.mxu0 %v2062_v7 }
  0x81   :  { %1813 = vmatpush3.bf16.msra.mxu1 %v2066_v8  ;;  %1176 = vmatprep.subr.bf16.mxu0 %v2069_v3 }
  0x82   :  { %1814 = vmatprep.subr.bf16.mxu1 %v2070_v9 }
  0x84   :  { %1177 = vmatpush2.bf16.msra.mxu0 %v2067_v10  ;;  %v233_v10 = vsub.s32 0, %v2207_v42 }
  0x85   :  { %1815 = vmatpush3.bf16.msra.mxu1 %v2071_v11  ;;  %1178 = vmatprep.subr.bf16.mxu0 %v2074_v12  ;;  %v229_v11 = vld [vmem:[%s2329_s2] sm:$0x7]  ;;  %v237_v12 = vsub.s32 1, %v2207_v42 }
  0x86   :  { %1816 = vmatprep.subr.bf16.mxu1 %v2075_v13  ;;  %v234_v13 = vrot.slane %v229_v11, %v233_v10 }
  0x88   :  { %1179 = vmatpush2.bf16.msra.mxu0 %v2072_v14  ;;  %v238_v14 = vrot.slane %v229_v11, %v237_v12 }
  0x89   :  { %1817 = vmatpush3.bf16.msra.mxu1 %v2076_v15  ;;  %1180 = vmatprep.subr.bf16.mxu0 %v2079_v16 }
  0x8a   :  { %1818 = vmatprep.subr.bf16.mxu1 %v2080_v17 }
  0x8c   :  { %1181 = vmatpush2.bf16.msra.mxu0 %v2077_v18 }
  0x8d   :  { %1819 = vmatpush3.bf16.msra.mxu1 %v2081_v20  ;;  %1826 = vmatprep.subr.bf16.mxu0 %v2083_v21 }
  0x8e   :  { %1848 = vmatprep.subr.bf16.mxu1 %v2099_v29 }
  0x8f   :  { %1183 = vmatmul.mubr.bf16.vlgmr.msra.gmra.mxu0 %v2219_v0 }
  0x90   :  { %1264 = vmatmul.mubr.bf16.vlgmr.msra.gmra.mxu1 %v2229_v19  ;;  %1827 = vmatpush3.bf16.msra.mxu0 %v2084_v22  ;;  %v2101_v19 = vld [vmem:[%s2330_s3 + $0x70] sm:$0xff]  }
  0x91   :  { %1303 = vmatprep.mubr.bf16.mxu0 %v2232_v23  ;;  %1828 = vmatprep.subr.bf16.mxu0 %v2085_v24  ;;  %v2090_v23 = vld [vmem:[#allocation2 + $0x368] ss:$12 sps:$4 sm:$0xff]  }
  0x92   :  { %1849 = vmatpush3.bf16.msra.mxu1 %v2100_v30 }
  0x93   :  { %1850 = vmatprep.subr.bf16.mxu1 %v2101_v19 }
  0x94   :  { %1829 = vmatpush3.bf16.msra.mxu0 %v2086_v25 }
  0x95   :  { %1830 = vmatprep.subr.bf16.mxu0 %v2087_v26 }
  0x96   :  { %1851 = vmatpush3.bf16.msra.mxu1 %v2102_v31 }
  0x97   :  { %1852 = vmatprep.subr.bf16.mxu1 %v2103_v33  ;;  %v241_v33 = vsub.s32 2, %v2207_v42  ;;  %v1757_v42 = vld [vmem:[%s2331_s4] ss:$0 sm:$0xff] }
  0x98   :  { %1831 = vmatpush3.bf16.msra.mxu0 %v2088_v27 }
  0x99   :  { %1832 = vmatprep.subr.bf16.mxu0 %v2089_v28 }
  0x9a   :  { %1853 = vmatpush3.bf16.msra.mxu1 %v2104_v35 }
  0x9b   :  { %1854 = vmatprep.subr.bf16.mxu1 %v2105_v37 }
  0x9c   :  { %1833 = vmatpush3.bf16.msra.mxu0 %v2090_v23 }
  0x9d   :  { %1834 = vmatprep.subr.bf16.mxu0 %v2091_v32 }
  0x9e   :  { %1855 = vmatpush3.bf16.msra.mxu1 %v2106_v39 }
  0x9f   :  { %1856 = vmatprep.subr.bf16.mxu1 %v2107_v45 }
  0xa0   :  { %1835 = vmatpush3.bf16.msra.mxu0 %v2092_v34  ;;  %v242_v34 = vrot.slane %v229_v11, %v241_v33 }
  0xa1   :  { %1836 = vmatprep.subr.bf16.mxu0 %v2093_v36 }
  0xa2   :  { %1857 = vmatpush3.bf16.msra.mxu1 %v2108_v46 }
  0xa3   :  { %1858 = vmatprep.subr.bf16.mxu1 %v2109_v47 }
  0xa4   :  { %1837 = vmatpush3.bf16.msra.mxu0 %v2094_v38 }
  0xa5   :  { %1838 = vmatprep.subr.bf16.mxu0 %v2095_v40 }
  0xa6   :  { %1859 = vmatpush3.bf16.msra.mxu1 %v2110_v48 }
  0xa8   :  { %1839 = vmatpush3.bf16.msra.mxu0 %v2096_v41 }
  0xa9   :  { %1840 = vmatprep.subr.bf16.mxu0 %v2097_v43 }
  0xac   :  { %1841 = vmatpush3.bf16.msra.mxu0 %v2098_v44 }
  0xad   :  { %1879 = vmatprep.subr.bf16.mxu0 %v2171_v53 }
  0xaf   :  { %1304 = vmatmul.mubr.bf16.vlgmr.msra.gmra.mxu0 %v2219_v0  ;;  %v2111_v0 = vld [vmem:[%s2330_s3 + $0x48] sm:$0xff]  }
  0xb0   :  { %1860 = vmatprep.subr.bf16.mxu1 %v2111_v0  ;;  %1880 = vmatpush3.bf16.msra.mxu0 %v2115_v52 }
  0xb1   :  { %1861 = vmatpush3.bf16.msra.mxu1 %v2112_v49  ;;  %1881 = vmatprep.subr.bf16.mxu0 %v2171_v53 }
  0xb2   :  { %1862 = vmatprep.subr.bf16.mxu1 %v2113_v50  ;;  %1895 = vmatprep.mubr.msk.bf16.mxu0 %vm2172_vm0, %v2171_v53 }
  0xb4   :  { %1882 = vmatpush3.bf16.msra.mxu0 %v2116_v54 }
  0xb5   :  { %1863 = vmatpush3.bf16.msra.mxu1 %v2114_v51  ;;  %1883 = vmatprep.subr.bf16.mxu0 %v2171_v53 }
  0xb8   :  { %1884 = vmatpush3.bf16.msra.mxu0 %v2117_v55 }
  0xb9   :  { %1885 = vmatprep.subr.bf16.mxu0 %v2171_v53 }
  0xbc   :  { %1886 = vmatpush3.bf16.msra.mxu0 %v2118_v56 }
  0xbd   :  { %1887 = vmatprep.subr.bf16.mxu0 %v2171_v53 }
  0xc0   :  { %1888 = vmatpush3.bf16.msra.mxu0 %v2119_v57 }
  0xc1   :  { %1889 = vmatprep.subr.bf16.mxu0 %v2171_v53 }
  0xc4   :  { %1890 = vmatpush3.bf16.msra.mxu0 %v2120_v58 }
  0xc5   :  { %1891 = vmatprep.subr.bf16.mxu0 %v2171_v53 }
  0xc8   :  { %1892 = vmatpush3.bf16.msra.mxu0 %v2121_v59 }
  0xc9   :  { %1893 = vmatprep.subr.bf16.mxu0 %v2171_v53 }
  0xcc   :  { %1894 = vmatpush3.bf16.msra.mxu0 %v2122_v60 }
 0x10f   :  { %v1102_v61 = vpop.f32.mrf.mxu0 }
 0x110   :  { %v1143_v62 = vpop.f32.mrf.mxu1  ;;  %v1103_v15 = vadd.f32 %v1102_v61, %v234_v13 }
 0x111   :  { %v1104_v63 = vpop.f32.mrf.mxu0 }
 0x112   :  { %v1145_v1 = vpop.f32.mrf.mxu1  ;;  %v1105_v16 = vadd.f32 %v1104_v63, %v238_v14  ;;  %v1144_v17 = vadd.f32 %v1143_v62, %v1103_v15 }
 0x113   :  { %v1106_v2 = vpop.f32.mrf.mxu0 }
 0x114   :  { %v1147_v4 = vpop.f32.mrf.mxu1  ;;  %v1146_v21 = vadd.f32 %v1145_v1, %v1105_v16 }
 0x115   :  { %v1107_v5 = vpop.f32.mrf.mxu0 }
 0x116   :  { %v1148_v6 = vpop.f32.mrf.mxu1 }
 0x130   :  { %v1798_v7 = vpop.f32.mrf.mxu1 }
 0x132   :  { %v1799_v8 = vpop.f32.mrf.mxu1 }
 0x133   :  { %v1800_v35 = vadd.f32 %v1799_v8, %v1798_v7 }
 0x134   :  { %v1801_v3 = vpop.f32.mrf.mxu1 }
 0x135   :  { %v1226_v36 = vadd.f32 %v1800_v35, %v242_v34 }
 0x136   :  { %v1802_v9 = vpop.f32.mrf.mxu1 }
 0x14f   :  { %v1184_v18 = vpop.f32.mrf.mxu0 }
 0x150   :  { %v1820_v20 = vpop.f32.mrf.mxu1  ;;  %v1185_v22 = vadd.f32 %v1184_v18, %v1144_v17 }
 0x151   :  { %v1186_v24 = vpop.f32.mrf.mxu0 }
 0x152   :  { %v1821_v25 = vpop.f32.mrf.mxu1  ;;  %v1187_v26 = vadd.f32 %v1186_v24, %v1146_v21  ;;  %v1311_v27 = vmax.f32 %v1185_v22, 0.0 }
 0x153   :  { %v1188_v28 = vpop.f32.mrf.mxu0  ;;  %v1822_v37 = vadd.f32 %v1821_v25, %v1820_v20 }
 0x154   :  { %v1823_v29 = vpop.f32.mrf.mxu1  ;;  %v1312_v30 = vmax.f32 %v1187_v26, 0.0  ;;  %v1314_v32 = vpack.c.bf16 %v1311_v27, %v1311_v27 }
 0x155   :  { %v1189_v19 = vpop.f32.mrf.mxu0  ;;  %v1266_v40 = vadd.f32 %v1822_v37, %v1226_v36 }
 0x156   :  { %v1824_v23 = vpop.f32.mrf.mxu1  ;;  %v1315_v31 = vpack.c.bf16 %v1312_v30, %v1312_v30 }
 0x158   :  { %1548 = vmatprep.mubr.bf16.mxu1 %v1315_v31 }
 0x159   :  { %1549 = vmatmul.mubr.bf16.vlgmr.msra.gmra.mxu1 %v1314_v32 }
 0x16f   :  { %v1842_v38 = vpop.f32.mrf.mxu0 }
 0x171   :  { %v1843_v39 = vpop.f32.mrf.mxu0 }
 0x172   :  { %v1844_v41 = vadd.f32 %v1843_v39, %v1842_v38 }
 0x173   :  { %v1845_v43 = vpop.f32.mrf.mxu0 }
 0x174   :  { %v1306_v44 = vadd.f32 %v1844_v41, %v1266_v40 }
 0x175   :  { %v1846_v45 = vpop.f32.mrf.mxu0 }
 0x176   :  { %v1313_v46 = vmax.f32 %v1306_v44, 0.0 }
 0x178   :  { %v1316_v47 = vpack.c.bf16 %v1313_v46, %v1313_v46 }
 0x17a   :  { %1896 = vmatmul.mubr.bf16.vlgmr.msra.gmra.mxu0 %v1316_v47 }
 0x219   :  { %v1864_v48 = vpop.f32.mrf.mxu1 }
 0x21b   :  { %v1865_v0 = vpop.f32.mrf.mxu1 }
 0x21c   :  { %v1866_v51 = vadd.f32 %v1865_v0, %v1864_v48 }
 0x21d   :  { %v1867_v49 = vpop.f32.mrf.mxu1 }
 0x21e   :  { %v1551_v52 = vadd.f32 %v1866_v51, %v1757_v42 }
 0x21f   :  { %v1868_v50 = vpop.f32.mrf.mxu1 }
 0x23a   :  { %v1590_v53 = vpop.f32.mrf.mxu0 }
 0x23b   :  { %v1591_v54 = vadd.f32 %v1590_v53, %v1551_v52 }
 0x23c   :  { %v1897_v55 = vpop.f32.mrf.mxu0 }
 0x23d   :  { %1597 = vst.msk [vmem:[#allocation5] sm:$0x3] %vm1596_vm1, %v1591_v54 }
 0x23e   :  { %v1593_v56 = vpop.f32.mrf.mxu0 }
 0x23f   :  { %2154 = shalt.err (!%p2151_p9)
}
 0x240   :  { %1607 = dma.vmem_to_hbm [thread:$0]  %s1605_s24, 32, %s2332_s5, [#allocation4]   ;;  %v1898_v57 = vpop.f32.mrf.mxu0 }
 0x241   :  { %2165 = dma.done.wait [#allocation4], 32  }
 0x242   :  { %2166 = vsyncadd [#allocation4], 4294967264 }
 0x243   :  { %1611 = vsyncpa [#allocation3], 1 }
 0x244   :  { %1612 = vsyncpa [#allocation4], 1 }

</bundles_post_ra>
